<compile_context>
chip_gen: v5e
topology: v5e:2x2
jax: 0.10.0
libtpu: 0.0.40
codegen_flags: <defaults>
</compile_context>

<pallas_src>
import functools

import jax
import jax.numpy as jnp
from jax.experimental import pallas as pl
from jax.experimental.pallas import tpu as pltpu


def _round_up(x: int, m: int) -> int:
    return (x + m - 1) // m * m


def _start_loss_kernel(logits_ref, labels_ref, out_ref, *, n_valid: int):
    i = pl.program_id(0)

    logits = logits_ref[...].astype(jnp.float32)   # (TILE_N, C)
    labels = labels_ref[...].astype(jnp.float32)   # (TILE_N, C)
    tn, c = logits.shape

    # Row-validity mask (N is padded up to a multiple of TILE_N in the wrapper).
    row = i * tn + jax.lax.broadcasted_iota(jnp.int32, (tn, 1), 0)
    valid = (row < n_valid).astype(jnp.float32)    # (TILE_N, 1)

    # ---------- softmax cross-entropy with argmax(labels) targets ----------
    # (1, C) iota broadcasts against the (TILE_N, C)/(TILE_N, 1) operands, so no
    # tile-sized int32 temporary is materialized. First-index-of-max tie-break
    # matches torch.argmax / jnp.argmax.
    col = jax.lax.broadcasted_iota(jnp.int32, (1, c), 1)                          # (1, C)
    lab_max = jnp.max(labels, axis=1, keepdims=True)                              # (TILE_N, 1)
    idx = jnp.min(jnp.where(labels >= lab_max, col, c), axis=1, keepdims=True)    # (TILE_N, 1)
    picked = jnp.sum(jnp.where(col == idx, logits, 0.0), axis=1, keepdims=True)   # (TILE_N, 1)

    row_max = jnp.max(logits, axis=1, keepdims=True)
    lse = jnp.log(jnp.sum(jnp.exp(logits - row_max), axis=1, keepdims=True)) + row_max
    ce_row = lse - picked                                                         # (TILE_N, 1)

    # ---------- focal loss (gamma = 2), minimal-EUP rewrites ----------
    # BCE-with-logits:  x - x*y + max(-x,0) + log(exp(-max_val)+exp(-x-max_val))
    #                == max(x,0) - x*y + log1p(exp(-|x|))          (exact identity)
    bce = (jnp.maximum(logits, 0.0) - logits * labels
           + jnp.log1p(jnp.exp(-jnp.abs(logits))))
    # exp(2*log_sigmoid(z)) == sigmoid(z)^2, computed with 1 exp + 1 reciprocal
    # instead of exp + log1p + exp.  (approx=True reciprocal would shave a bit
    # more but is kept exact to hold the 1e-5 tolerance vs. the reference.)
    z = logits * (1.0 - 2.0 * labels)              # == -logits * (2*labels - 1)
    t = jnp.exp(-jnp.abs(z))
    sig = jnp.where(z >= 0.0, 1.0, t) * pl.reciprocal(1.0 + t, approx=False)
    focal_row = jnp.sum(sig * sig * bce, axis=1, keepdims=True)                   # (TILE_N, 1)

    # Fused, masked tail: one weighted per-row loss, one cross-sublane sum.
    row_loss = (0.25 * ce_row + 0.75 * focal_row) * valid
    partial = jnp.sum(row_loss)

    # Lane-dense (8,128) splat -> unmasked full-vreg store for this tile's block.
    out_ref[...] = jnp.full(out_ref.shape, partial, dtype=jnp.float32)


def start_loss(logits, labels, *, tile_n: int | None = None):
    assert logits.shape == labels.shape and logits.ndim == 2
    n, c = logits.shape

    # Tile sizing: ~1 MiB per input tile (in the *input* dtype).  2 inputs x
    # 2 pipeline buffers = 4 MiB of pipelined VMEM; the in-kernel f32 upcasts
    # and elementwise temporaries add a few more tile-sized buffers, keeping
    # the total comfortably under the scoped-VMEM budget on every generation
    # (v5e default 16 MiB, v6e/v7x 32 MiB) while amortizing the ~0.35 us
    # per-grid-step overhead.
    if tile_n is None:
        bytes_per_row = c * max(logits.dtype.itemsize, labels.dtype.itemsize)
        target_rows = max(8, (1 * 1024 * 1024) // max(bytes_per_row, 1))
        tile_n = min(_round_up(n, 8), _round_up(target_rows, 8))
    tile_n = max(8, (tile_n // 8) * 8)

    n_pad = _round_up(n, tile_n)
    if n_pad != n:
        pad = n_pad - n
        logits = jnp.pad(logits, ((0, pad), (0, 0)))
        labels = jnp.pad(labels, ((0, pad), (0, 0)))
    num_tiles = n_pad // tile_n

    kernel = functools.partial(_start_loss_kernel, n_valid=n)

    partials = pl.pallas_call(
        kernel,
        out_shape=jax.ShapeDtypeStruct((num_tiles, 8, 128), jnp.float32),
        grid_spec=pltpu.PrefetchScalarGridSpec(
            num_scalar_prefetch=0,
            grid=(num_tiles,),
            in_specs=[
                pl.BlockSpec((tile_n, c), lambda i: (i, 0)),
                pl.BlockSpec((tile_n, c), lambda i: (i, 0)),
            ],
            out_specs=pl.BlockSpec((1, 8, 128), lambda i: (i, 0, 0)),
        ),
        compiler_params=pltpu.CompilerParams(
            dimension_semantics=("parallel",),
            vmem_limit_bytes=32 * 1024 * 1024,
        ),
    )(logits, labels)

    # Tiny cross-tile reduction + batch mean in plain JAX.
    return jnp.sum(partials[:, 0, 0]) / jnp.float32(n)


def _ref_start_loss(logits, labels):
    # Plain-JAX reference mirroring the PyTorch module.
    targets = jnp.argmax(labels, axis=1)
    logp = jax.nn.log_softmax(logits, axis=1)
    ce = -jnp.take_along_axis(logp, targets[:, None], axis=1)[:, 0]
    loss_softmax = jnp.mean(ce)

    max_val = jnp.maximum(-logits, 0.0)
    bce = (logits - logits * labels + max_val
           + jnp.log(jnp.exp(-max_val) + jnp.exp(-logits - max_val)))
    invprobs = jax.nn.log_sigmoid(-logits * (labels * 2.0 - 1.0))
    focal = jnp.exp(invprobs * 2.0) * bce
    loss_focal = jnp.mean(jnp.sum(focal, axis=1))
    return 0.25 * loss_softmax + 0.75 * loss_focal


if __name__ == "__main__":
    key = jax.random.PRNGKey(0)
    k_logit, k_label, k_logit2, k_label2 = jax.random.split(key, 4)

    # Case 1: one-hot labels, N divisible by the tile size.
    N, C = 8, 16
    logits = jax.random.normal(k_logit, (N, C), dtype=jnp.float32)
    label_idx = jax.random.randint(k_label, (N,), 0, C)
    labels = jax.nn.one_hot(label_idx, C, dtype=jnp.float32)

    out = start_loss(logits, labels)
    jax.block_until_ready(out)
    ref = _ref_start_loss(logits, labels)
    assert jnp.allclose(out, ref, atol=2e-5, rtol=2e-5), (out, ref)

    # Case 2: soft labels and a batch size that is not a tile multiple
    # (exercises argmax path + padded-row masking).
    N2, C2 = 11, 16
    logits2 = jax.random.normal(k_logit2, (N2, C2), dtype=jnp.float32)
    labels2 = jax.nn.softmax(jax.random.normal(k_label2, (N2, C2), dtype=jnp.float32), axis=1)

    out2 = start_loss(logits2, labels2)
    jax.block_until_ready(out2)
    ref2 = _ref_start_loss(logits2, labels2)
    assert jnp.allclose(out2, ref2, atol=2e-5, rtol=2e-5), (out2, ref2)

    print("KERNEL_OK")
</pallas_src>

<mosaic_0001>
module attributes {stable_mosaic.version = 11 : i64} {
  func.func @_start_loss_kernel(%arg0: i32, %arg1: memref<8x16xf32, #tpu.memory_space<vmem>>, %arg2: memref<8x16xf32, #tpu.memory_space<vmem>>, %arg3: memref<1x8x128xf32, #tpu.memory_space<vmem>>) attributes {dimension_semantics = [#tpu.dimension_semantics<parallel>], iteration_bounds = array<i64: 1>, scalar_prefetch = 0 : i64, scratch_operands = 0 : i64, tpu.core_type = #tpu.core_type<tc>, window_params = [{transform_indices = @transform_0, window_bounds = array<i64: 8, 16>}, {transform_indices = @transform_1, window_bounds = array<i64: 8, 16>}, {transform_indices = @transform_2, window_bounds = array<i64: 1, 8, 128>}]} {
    %c0 = arith.constant 0 : index
    %c0_0 = arith.constant 0 : index
    %0 = vector.load %arg1[%c0, %c0_0] : memref<8x16xf32, #tpu.memory_space<vmem>>, vector<8x16xf32>
    %c0_1 = arith.constant 0 : index
    %c0_2 = arith.constant 0 : index
    %1 = vector.load %arg2[%c0_1, %c0_2] : memref<8x16xf32, #tpu.memory_space<vmem>>, vector<8x16xf32>
    %c8_i32 = arith.constant 8 : i32
    %2 = arith.muli %arg0, %c8_i32 : i32
    %3 = tpu.iota {dimensions = array<i32: 0>} : vector<8x1xi32>
    %4 = vector.broadcast %2 : i32 to vector<8x1xi32>
    %5 = arith.addi %4, %3 : vector<8x1xi32>
    %c8_i32_3 = arith.constant 8 : i32
    %6 = vector.broadcast %c8_i32_3 : i32 to vector<8x1xi32>
    %7 = arith.cmpi slt, %5, %6 : vector<8x1xi32>
    %8 = arith.extui %7 : vector<8x1xi1> to vector<8x1xi32>
    %9 = arith.sitofp %8 : vector<8x1xi32> to vector<8x1xf32>
    %10 = tpu.iota {dimensions = array<i32: 1>} : vector<1x16xi32>
    %cst = arith.constant dense<0xFF800000> : vector<8xf32>
    %11 = vector.multi_reduction <maximumf>, %1, %cst [1] : vector<8x16xf32> to vector<8xf32>
    %12 = vector.shape_cast %11 : vector<8xf32> to vector<8x1xf32>
    %13 = vector.broadcast %12 : vector<8x1xf32> to vector<8x16xf32>
    %14 = arith.cmpf oge, %1, %13 : vector<8x16xf32>
    %c16_i32 = arith.constant 16 : i32
    %15 = vector.shape_cast %10 : vector<1x16xi32> to vector<1x16xi32>
    %16 = vector.broadcast %15 : vector<1x16xi32> to vector<8x16xi32>
    %17 = vector.broadcast %c16_i32 : i32 to vector<8x16xi32>
    %18 = arith.select %14, %16, %17 : vector<8x16xi1>, vector<8x16xi32>
    %cst_4 = arith.constant dense<2147483647> : vector<8xi32>
    %19 = vector.multi_reduction <minsi>, %18, %cst_4 [1] : vector<8x16xi32> to vector<8xi32>
    %20 = vector.shape_cast %19 : vector<8xi32> to vector<8x1xi32>
    %21 = vector.broadcast %10 : vector<1x16xi32> to vector<8x16xi32>
    %22 = vector.broadcast %20 : vector<8x1xi32> to vector<8x16xi32>
    %23 = arith.cmpi eq, %21, %22 : vector<8x16xi32>
    %cst_5 = arith.constant 0.000000e+00 : f32
    %24 = vector.broadcast %cst_5 : f32 to vector<8x16xf32>
    %25 = arith.select %23, %0, %24 : vector<8x16xi1>, vector<8x16xf32>
    %cst_6 = arith.constant dense<0.000000e+00> : vector<8xf32>
    %26 = vector.multi_reduction <add>, %25, %cst_6 [1] : vector<8x16xf32> to vector<8xf32>
    %27 = vector.shape_cast %26 : vector<8xf32> to vector<8x1xf32>
    %cst_7 = arith.constant dense<0xFF800000> : vector<8xf32>
    %28 = vector.multi_reduction <maximumf>, %0, %cst_7 [1] : vector<8x16xf32> to vector<8xf32>
    %29 = vector.shape_cast %28 : vector<8xf32> to vector<8x1xf32>
    %30 = vector.broadcast %29 : vector<8x1xf32> to vector<8x16xf32>
    %31 = arith.subf %0, %30 : vector<8x16xf32>
    %32 = math.exp %31 : vector<8x16xf32>
    %cst_8 = arith.constant dense<0.000000e+00> : vector<8xf32>
    %33 = vector.multi_reduction <add>, %32, %cst_8 [1] : vector<8x16xf32> to vector<8xf32>
    %34 = vector.shape_cast %33 : vector<8xf32> to vector<8x1xf32>
    %35 = math.log %34 : vector<8x1xf32>
    %36 = arith.addf %35, %29 : vector<8x1xf32>
    %37 = arith.subf %36, %27 : vector<8x1xf32>
    %cst_9 = arith.constant 0.000000e+00 : f32
    %38 = vector.broadcast %cst_9 : f32 to vector<8x16xf32>
    %39 = arith.maximumf %0, %38 : vector<8x16xf32>
    %40 = arith.mulf %0, %1 : vector<8x16xf32>
    %41 = arith.subf %39, %40 : vector<8x16xf32>
    %42 = math.absf %0 : vector<8x16xf32>
    %cst_10 = arith.constant 0.000000e+00 : f32
    %43 = vector.broadcast %cst_10 : f32 to vector<8x16xf32>
    %44 = arith.subf %43, %42 : vector<8x16xf32>
    %45 = math.exp %44 : vector<8x16xf32>
    %46 = math.log1p %45 : vector<8x16xf32>
    %47 = arith.addf %41, %46 : vector<8x16xf32>
    %cst_11 = arith.constant 2.000000e+00 : f32
    %48 = vector.broadcast %cst_11 : f32 to vector<8x16xf32>
    %49 = arith.mulf %48, %1 : vector<8x16xf32>
    %cst_12 = arith.constant 1.000000e+00 : f32
    %50 = vector.broadcast %cst_12 : f32 to vector<8x16xf32>
    %51 = arith.subf %50, %49 : vector<8x16xf32>
    %52 = arith.mulf %0, %51 : vector<8x16xf32>
    %53 = math.absf %52 : vector<8x16xf32>
    %cst_13 = arith.constant 0.000000e+00 : f32
    %54 = vector.broadcast %cst_13 : f32 to vector<8x16xf32>
    %55 = arith.subf %54, %53 : vector<8x16xf32>
    %56 = math.exp %55 : vector<8x16xf32>
    %cst_14 = arith.constant 0.000000e+00 : f32
    %57 = vector.broadcast %cst_14 : f32 to vector<8x16xf32>
    %58 = arith.cmpf oge, %52, %57 : vector<8x16xf32>
    %cst_15 = arith.constant 1.000000e+00 : f32
    %59 = vector.broadcast %cst_15 : f32 to vector<8x16xf32>
    %60 = arith.select %58, %59, %56 : vector<8x16xi1>, vector<8x16xf32>
    %cst_16 = arith.constant 1.000000e+00 : f32
    %61 = vector.broadcast %cst_16 : f32 to vector<8x16xf32>
    %62 = arith.addf %61, %56 : vector<8x16xf32>
    %63 = tpu.reciprocal %62 : vector<8x16xf32> -> vector<8x16xf32>
    %64 = arith.mulf %60, %63 : vector<8x16xf32>
    %65 = arith.mulf %64, %64 : vector<8x16xf32>
    %66 = arith.mulf %65, %47 : vector<8x16xf32>
    %cst_17 = arith.constant dense<0.000000e+00> : vector<8xf32>
    %67 = vector.multi_reduction <add>, %66, %cst_17 [1] : vector<8x16xf32> to vector<8xf32>
    %68 = vector.shape_cast %67 : vector<8xf32> to vector<8x1xf32>
    %cst_18 = arith.constant 2.500000e-01 : f32
    %69 = vector.broadcast %cst_18 : f32 to vector<8x1xf32>
    %70 = arith.mulf %69, %37 : vector<8x1xf32>
    %cst_19 = arith.constant 7.500000e-01 : f32
    %71 = vector.broadcast %cst_19 : f32 to vector<8x1xf32>
    %72 = arith.mulf %71, %68 : vector<8x1xf32>
    %73 = arith.addf %70, %72 : vector<8x1xf32>
    %74 = arith.mulf %73, %9 : vector<8x1xf32>
    %75 = vector.shape_cast %74 : vector<8x1xf32> to vector<1x8x1xf32>
    %cst_20 = arith.constant dense<0.000000e+00> : vector<1xf32>
    %76 = vector.multi_reduction <add>, %75, %cst_20 [1, 2] : vector<1x8x1xf32> to vector<1xf32>
    %77 = vector.shape_cast %76 : vector<1xf32> to vector<1x1x1xf32>
    %78 = vector.extract %77[0, 0, 0] : f32 from vector<1x1x1xf32>
    %79 = vector.broadcast %78 : f32 to vector<1x8x128xf32>
    %c0_21 = arith.constant 0 : index
    %c0_22 = arith.constant 0 : index
    %c0_23 = arith.constant 0 : index
    %80 = vector.load %arg3[%c0_21, %c0_22, %c0_23] : memref<1x8x128xf32, #tpu.memory_space<vmem>>, vector<1x8x128xf32>
    tpu.vector_store %arg3[%c0_21, %c0_22, %c0_23], %79 {strides = array<i32>} : memref<1x8x128xf32, #tpu.memory_space<vmem>>, vector<1x8x128xf32>,
    return
  }
  func.func @transform_0(%arg0: i32) -> (i32, i32) {
    %c0_i32 = arith.constant 0 : i32
    %c0_i32_0 = arith.constant 0 : i32
    return %arg0, %c0_i32 : i32, i32
  }
  func.func @transform_1(%arg0: i32) -> (i32, i32) {
    %c0_i32 = arith.constant 0 : i32
    %c0_i32_0 = arith.constant 0 : i32
    return %arg0, %c0_i32 : i32, i32
  }
  func.func @transform_2(%arg0: i32) -> (i32, i32, i32) {
    %c0_i32 = arith.constant 0 : i32
    %c0_i32_0 = arith.constant 0 : i32
    %c0_i32_1 = arith.constant 0 : i32
    return %arg0, %c0_i32, %c0_i32_0 : i32, i32, i32
  }
}

</mosaic_0001>

<bundles_post_ra>
// kernel: tpu_custom_call.1
= control target key start
LH: loop header
LB: loop body
LE: loop exit
PB: predicated region body
PF: predicated region fallthrough
CT: control target
= control target key end

     0   :  { %7 = vsyncpa [#allocation3], 0  ;;  %s318_s0 = inlined_call_operand.hbm [shape: f32[8,16], index: 0, kind: input, shape index: {}]   ;;  %s319_s1 = inlined_call_operand.hbm [shape: f32[8,16], index: 1, kind: input, shape index: {}]   ;;  %s320_s2 = inlined_call_operand.hbm [shape: f32[1,8,128], index: 2, kind: output, shape index: {}]  }
   0x1   :  { %8 = vsyncpa [#allocation6], 0 }
   0x2   :  { %9 = vsyncpa [#allocation4], 0  ;;  %s15_s11 = sshll.u32 %s318_s0, 4  ;;  %s268_s12 = smov [#allocation2]   ;;  %s16_s11 = int_to_ptr.hbm [resolvable:$true] %s15_s11 }
   0x3   :  { %s17_s13 = sshll.u32 %s268_s12, 4  ;;  %s26_s16 = sshll.u32 %s319_s1, 4  ;;  %s18_s13 = int_to_ptr.vmem [resolvable:$true] %s17_s13  ;;  %s27_s16 = int_to_ptr.hbm [resolvable:$true] %s26_s16 }
   0x4   :  { %20 = dma.hbm_to_vmem [thread:$0]  %s16_s11, 128, %s18_s13, [#allocation3]  }
   0x5   :  { %s269_s17 = smov [#allocation5]  }
   0x6   :  { %s28_s18 = sshll.u32 %s269_s17, 4  ;;  %s29_s18 = int_to_ptr.vmem [resolvable:$true] %s28_s18 }
   0x7   :  { %31 = dma.hbm_to_vmem [thread:$0]  %s27_s16, 128, %s29_s18, [#allocation6]  }
   0x8   :  { %262 = dma.done.wait [#allocation3], 128  }
   0x9   :  { %263 = vsyncadd [#allocation3], 4294967168 }
   0xa   :  { %264 = dma.done.wait [#allocation6], 128  }
   0xb   :  { %265 = vsyncadd [#allocation6], 4294967168  ;;  %vm52_vm0 = vcmask 130048   ;;  %v41_v0 = vld [vmem:[#allocation5] sm:$0xff]  ;;  %v292_v1 = vld [vmem:[#allocation2] sm:$0xff]  ;;  %v50_v4 = vlaneseq  ;;  %vm142_vm10 = vcmask 7168  }
   0xc   :  { %v53_v2 = vsel %vm52_vm0, %v41_v0, -inf  ;;  %v78_v3 = vsel %vm52_vm0, %v292_v1, -inf  ;;  %v108_v20 = vmul.f32 2.0, %v41_v0  ;;  %v94_v24 = vand.u32 2147483647, %v292_v1  ;;  %s270_s0 = smov [#allocation7]  }
   0xd   :  { %54 = vmax.xlane.f32.xlu0 %v53_v2  ;;  %79 = vmax.xlane.f32.xlu1 %v78_v3  ;;  %v297_v5 = vand.u32 127, %v50_v4  ;;  %v92_v37 = vmul.f32 %v41_v0, %v292_v1  ;;  %v91_v45 = vmax.f32 %v292_v1, 0.0  ;;  %s160_s1 = sshll.u32 %s270_s0, 4  ;;  %s162_s21 = sshll.u32 %s320_s2, 4  ;;  %s161_s1 = int_to_ptr.vmem [resolvable:$true] %s160_s1  ;;  %s163_s21 = int_to_ptr.hbm [resolvable:$true] %s162_s21 }
   0xe   :  { %v109_v21 = vsub.f32 1.0, %v108_v20  ;;  %v95_v27 = vsub.f32 0.0, %v94_v24 }
   0xf   :  { %v93_v51 = vsub.f32 %v91_v45, %v92_v37 }
  0x10   :  { %v110_v22 = vmul.f32 %v109_v21, %v292_v1  ;;  %v96_v28 = vmul.f32 1.442695, %v95_v27 }
  0x12   :  { %v111_v23 = vand.u32 2147483647, %v110_v22  ;;  %vm115_vm6 = vcmp.ge.f32.partialorder %v110_v22, 0.0 }
  0x14   :  { %v112_v25 = vsub.f32 0.0, %v111_v23 }
  0x16   :  { %v113_v26 = vmul.f32 1.442695, %v112_v25 }
  0x80   :  { %v55_v6 = vpop.xlane.xlu0 %54  ;;  %v299_v7 = vpop.xlane.xlu1 %79 }
  0x81   :  { %vm56_vm1 = vcmp.ge.f32.partialorder %v41_v0, %v55_v6  ;;  %v81_v9 = vsub.f32 %v292_v1, %v299_v7 }
  0x82   :  { %v57_v8 = vsel %vm56_vm1, %v297_v5, 16 }
  0x83   :  { %v58_v10 = vsel %vm52_vm0, %v57_v8, 2147483647  ;;  %v82_v12 = vmul.f32 1.442695, %v81_v9 }
  0x84   :  { %v60_v11 = vshra.s32 %v58_v10, 16  ;;  %v59_v16 = vand.u32 65535, %v58_v10 }
  0x85   :  { %178 = vpow2.f32 %v82_v12 }
  0x86   :  { %v62_v13 = vcvt.s32.f32 %v60_v11  ;;  %v61_v18 = vcvt.s32.f32 %v59_v16  ;;  %180 = vpow2.f32 %v113_v26 }
  0x87   :  { %182 = vpow2.f32 %v96_v28 }
  0x88   :  { %63 = vmin.xlane.f32.xlu0 %v62_v13 }
  0x8b   :  { %v179_v14 = vpop.eup %178 }
  0x8c   :  { %v84_v15 = vsel %vm52_vm0, %v179_v14, 0.0  ;;  %v181_v29 = vpop.eup %180 }
  0x8d   :  { %85 = vadd.xlane.f32.xlu2 %v84_v15  ;;  %v117_v30 = vadd.f32 1.0, %v181_v29  ;;  %v183_v31 = vpop.eup %182  ;;  %v116_v50 = vsel %vm115_vm6, 1.0, %v181_v29 }
  0x8e   :  { %v98_v33 = vadd.f32 1.0, %v183_v31  ;;  %v101_v38 = vmul.f32 -0.5, %v183_v31  ;;  %v104_v46 = vand.u32 2147483647, %v183_v31 }
  0x8f   :  { %184 = vrcp.f32 %v117_v30  ;;  %v129_v39 = vand.u32 2147483648, %v117_v30  ;;  %vm123_vm3 = vweird.f32 %v117_v30  ;;  %v127_v41 = vand.u32 2147483647, %v117_v30 }
  0x90   :  { %186 = vlog2.f32 %v98_v33  ;;  %v102_v42 = vadd.f32 1.0, %v101_v38  ;;  %vm105_vm8 = vcmp.lt.f32.partialorder %v104_v46, 0.0004427343 }
  0x91   :  { %v130_v43 = vor.u32 1.1754944e-38, %v129_v39  ;;  %vm128_vm7 = vcmp.eq.f32.partialorder %v127_v41, 8.507059e+37 }
  0x92   :  { %v103_v49 = vmul.f32 %v183_v31, %v102_v42 }
  0x95   :  { %v185_v32 = vpop.eup %184 }
  0x96   :  { %v119_v34 = vmul.f32 %v185_v32, %v117_v30  ;;  %vm124_vm4 = vweird.f32 %v185_v32  ;;  %v187_v44 = vpop.eup %186 }
  0x97   :  { %vm125_vm5 = vmor %vm123_vm3, %vm124_vm4  ;;  %v100_v48 = vmul.f32 0.6931472, %v187_v44 }
  0x98   :  { %v120_v35 = vsub.f32 1.0, %v119_v34 }
  0x99   :  { %v106_v53 = vsel %vm105_vm8, %v103_v49, %v100_v48 }
  0x9a   :  { %v121_v36 = vmul.f32 %v185_v32, %v120_v35  ;;  %v107_v55 = vadd.f32 %v106_v53, %v93_v51 }
  0x9c   :  { %v122_v40 = vadd.f32 %v185_v32, %v121_v36 }
  0x9e   :  { %v126_v47 = vsel %vm125_vm5, %v185_v32, %v122_v40 }
  0x9f   :  { %v131_v52 = vsel %vm128_vm7, %v130_v43, %v126_v47 }
  0xa0   :  { %v132_v54 = vmul.f32 %v131_v52, %v116_v50 }
  0xa2   :  { %v133_v56 = vmul.f32 %v132_v54, %v132_v54 }
  0xa4   :  { %v134_v57 = vmul.f32 %v133_v56, %v107_v55 }
  0xa6   :  { %v135_v58 = vsel %vm52_vm0, %v134_v57, 0.0 }
  0xa7   :  { %136 = vadd.xlane.f32.xlu0 %v135_v58 }
  0xfb   :  { %v64_v17 = vpop.xlane.xlu0 %63 }
  0xfc   :  { %vm65_vm2 = vcmp.eq.f32.partialorder %v62_v13, %v64_v17  ;;  %v70_v59 = vcvt.f32.s32 %v64_v17 }
  0xfd   :  { %v66_v19 = vsel %vm65_vm2, %v61_v18, inf }
  0xfe   :  { %67 = vmin.xlane.f32.xlu1 %v66_v19  ;;  %v71_v61 = vshll.u32 %v70_v59, 16 }
 0x100   :  { %v86_v3 = vpop.xlane.xlu2 %85 }
 0x101   :  { %188 = vlog2.f32 %v86_v3 }
 0x107   :  { %v189_v4 = vpop.eup %188 }
 0x108   :  { %v88_v6 = vmul.f32 0.6931472, %v189_v4 }
 0x10a   :  { %v89_v9 = vadd.f32 %v88_v6, %v299_v7 }
 0x11a   :  { %v137_v8 = vpop.xlane.xlu0 %136 }
 0x11b   :  { %v139_v12 = vmul.f32 0.75, %v137_v8 }
 0x171   :  { %v68_v60 = vpop.xlane.xlu1 %67 }
 0x172   :  { %v69_v62 = vcvt.f32.s32 %v68_v60 }
 0x174   :  { %v72_v63 = vadd.s32 %v71_v61, %v69_v62 }
 0x176   :  { %vm73_vm9 = vcmp.eq.s32.totalorder %v297_v5, %v72_v63 }
 0x177   :  { %v74_v0 = vsel %vm73_vm9, %v292_v1, 0.0 }
 0x178   :  { %v75_v2 = vsel %vm52_vm0, %v74_v0, 0.0 }
 0x179   :  { %76 = vadd.xlane.f32.xlu2 %v75_v2 }
 0x1ec   :  { %v77_v10 = vpop.xlane.xlu2 %76 }
 0x1ed   :  { %v90_v11 = vsub.f32 %v89_v9, %v77_v10 }
 0x1ef   :  { %v138_v13 = vmul.f32 0.25, %v90_v11 }
 0x1f1   :  { %v140_v14 = vadd.f32 %v139_v12, %v138_v13 }
 0x1f3   :  { %v143_v15 = vsel %vm142_vm10, %v140_v14, 0.0 }
 0x1f4   :  { %144 = vadd.xlane.f32.xlu1 %v143_v15 }
 0x267   :  { %v145_v5 = vpop.xlane.xlu1 %144 }
 0x268   :  { %v146_v1 = vrot.slane %v145_v5, 4 }
 0x26a   :  { %v147_v16 = vadd.f32 %v146_v1, %v145_v5 }
 0x26c   :  { %v148_v17 = vrot.slane %v147_v16, 2 }
 0x26e   :  { %v149_v18 = vadd.f32 %v148_v17, %v147_v16 }
 0x270   :  { %v150_v19 = vrot.slane %v149_v18, 1 }
 0x272   :  { %v151_v20 = vadd.f32 %v150_v19, %v149_v18 }
 0x274   :  { %173 = vpush %v151_v20 }
 0x2a5   :  { %s174_s22 = spop %173 }
 0x2a6   :  { %v153_v7 = vstv %s174_s22 }
 0x2a7   :  { %154 = vst [vmem:[#allocation7] sm:$0xff] %v153_v7 }
 0x2a8   :  { %165 = dma.vmem_to_hbm [thread:$0]  %s161_s1, 128, %s163_s21, [#allocation4]  }
 0x2a9   :  { %266 = dma.done.wait [#allocation4], 128  }
 0x2aa   :  { %267 = vsyncadd [#allocation4], 4294967168 }
 0x2ab   :  { %170 = vsyncpa [#allocation3], 1 }
 0x2ac   :  { %171 = vsyncpa [#allocation6], 1 }
 0x2ad   :  { %172 = vsyncpa [#allocation4], 1 }

</bundles_post_ra>
